<compile_context>
chip_gen: v7x
topology: tpu7x:2x2x1
jax: 0.10.0
libtpu: 0.0.40
codegen_flags: <defaults>
</compile_context>

<pallas_src>
import functools

import numpy as np
import jax
import jax.numpy as jnp
from jax import lax
from jax.experimental import pallas as pl
from jax.experimental.pallas import tpu as pltpu

LANES = 128       # vreg lane width
MAX_ROWS = 512    # sublane rows per block -> 512*128 = 65536 boxes / block
_EPS = 1e-7


def _gwd_kernel(*refs, alpha, tau, fun, normalize, n_boxes, weight_mode):
    """One grid step: a (C, T, 128) component-major slab of boxes in, an
    (8, 128) partial sum of weighted per-box GWD distances out."""
    if weight_mode == 'stream':
        pred_ref, targ_ref, w_ref, out_ref = refs
    else:
        pred_ref, targ_ref, out_ref = refs
        w_ref = None

    f32 = jnp.float32
    p = lambda c: pred_ref[c].astype(f32)   # (T, 128) dense tiles
    t = lambda c: targ_ref[c].astype(f32)

    # --- preprocess: xy_stddev_pearson_2_xy_sigma -------------------------
    xp, yp, sxp, syp = p(0), p(1), p(2), p(3)
    rp = jnp.clip(p(4), _EPS - 1.0, 1.0 - _EPS)
    xt, yt, sxt, syt = t(0), t(1), t(2), t(3)
    rt = jnp.clip(t(4), _EPS - 1.0, 1.0 - _EPS)

    # Sigma_p = [[ap, bp], [bp, dp]], Sigma_t = [[at, bt], [bt, dt]]
    ap, dp, bp = sxp * sxp, syp * syp, rp * sxp * syp
    at, dt, bt = sxt * sxt, syt * syt, rt * sxt * syt

    # --- gwd_loss ----------------------------------------------------------
    dx, dy = xp - xt, yp - yt
    xy_dist = dx * dx + dy * dy
    whr = ap + dp + at + dt                               # Tr(Sp) + Tr(St)
    t_tr = ap * at + 2.0 * bp * bt + dp * dt              # Tr(Sp @ St)
    det_p = ap * dp - bp * bp
    det_t = at * dt - bt * bt
    t_det_sqrt = jnp.sqrt(jnp.maximum(det_p * det_t, 0.0))
    whr = whr - 2.0 * jnp.sqrt(jnp.maximum(t_tr + 2.0 * t_det_sqrt, 0.0))
    dist = jnp.sqrt(jnp.maximum(xy_dist + (alpha * alpha) * whr, 0.0))

    if normalize:
        scale = 2.0 * jnp.maximum(jnp.sqrt(jnp.sqrt(t_det_sqrt)), 1e-7)
        dist = dist * pl.reciprocal(scale, approx=False)

    # --- postprocess ---------------------------------------------------------
    if fun == 'log1p':
        dist = jnp.log1p(dist)
    if tau >= 1.0:
        dist = 1.0 - pl.reciprocal(tau + dist, approx=False)

    # --- weighting / padding mask -------------------------------------------
    if weight_mode == 'plane':
        # Weight travels as the 6th plane of the pred slab; its zero padding
        # also masks the padded tail boxes.
        dist = dist * pred_ref[5].astype(f32)
    elif weight_mode == 'stream':
        dist = dist * w_ref[...].astype(f32)
    elif tau >= 1.0:
        # Only needed here: padded (all-zero) boxes give dist == 0 when
        # tau < 1, and a weight plane/stream already zeroes them otherwise.
        T, L = dist.shape
        blk = pl.program_id(0)
        row_ids = lax.broadcasted_iota(jnp.int32, (T, L), 0)
        lane_ids = lax.broadcasted_iota(jnp.int32, (T, L), 1)
        gidx = blk * (T * L) + row_ids * L + lane_ids
        dist = jnp.where(gidx < n_boxes, dist, 0.0)

    # --- reduce (T, 128) -> (8, 128) with vreg-aligned static slices --------
    T, L = dist.shape
    partial = dist[0:8, :]
    for j in range(1, T // 8):
        partial = partial + dist[j * 8:(j + 1) * 8, :]
    out_ref[0, :, :] = partial


def _to_component_major(x):
    """Accept boxes as (N, 5) (torch layout) or (5, N) (fast path)."""
    if x.ndim != 2:
        raise ValueError(f"expected a 2-D box tensor, got shape {x.shape}")
    if x.shape[0] == 5 and x.shape[1] != 5:
        return x                      # already component-major, no copy
    if x.shape[-1] != 5:
        raise ValueError(f"boxes must have 5 components, got shape {x.shape}")
    # TODO(synk): have the producer emit (5, N) component-major boxes so this
    # HBM transpose (an extra read+write of the inputs) disappears entirely.
    return x.T


@functools.partial(jax.jit, static_argnames=('fun', 'tau', 'alpha',
                                              'reduction', 'loss_weight'))
def _gwd_forward(pred, target, weight, avg_factor, *, fun, tau, alpha,
                 reduction, loss_weight):
    pred = _to_component_major(jnp.asarray(pred))
    target = _to_component_major(jnp.asarray(target))
    if pred.shape != target.shape:
        raise ValueError("pred and target must have the same shape")
    n = pred.shape[1]
    if n == 0:
        raise ValueError("empty box set is not supported")  # TODO(synk)

    # bf16 inputs stay bf16 on the wire; compute is f32 inside the kernel.
    slab_dtype = jnp.bfloat16 if pred.dtype == jnp.bfloat16 else jnp.float32
    row_align = 16 if slab_dtype == jnp.bfloat16 else 8

    n_rows = -(-n // LANES)
    T = min(MAX_ROWS, ((n_rows + row_align - 1) // row_align) * row_align)
    num_blocks = -(-n_rows // T)
    rows_pad = num_blocks * T
    n_pad = rows_pad * LANES
    pad = n_pad - n
    if n_pad >= 2 ** 31:
        raise ValueError("too many boxes for int32 in-kernel indexing")

    # --- optional per-box weight ------------------------------------------
    weight_mode = 'none'
    w_plane = None
    w_args = []
    if weight is not None:
        w = jnp.asarray(weight, jnp.float32).reshape(-1)
        if w.shape[0] != n:
            raise ValueError("weight must be a per-box (N,) tensor")
        if slab_dtype == jnp.float32:
            weight_mode = 'plane'          # packed as 6th plane of pred slab
            w_plane = w
        else:
            weight_mode = 'stream'         # keep full f32 precision for bf16 slabs
            w_args = [jnp.pad(w, (0, pad)).reshape(rows_pad, LANES)]

    # --- component-major slabs: (C, rows_pad, 128) --------------------------
    def to_slab(x_cm, extra=None):
        x_cm = x_cm.astype(slab_dtype)
        if extra is not None:
            x_cm = jnp.concatenate([x_cm, extra.astype(slab_dtype)[None, :]],
                                   axis=0)
        x_cm = jnp.pad(x_cm, ((0, 0), (0, pad)))
        return x_cm.reshape(x_cm.shape[0], rows_pad, LANES)

    pred_s = to_slab(pred, w_plane)
    targ_s = to_slab(target)
    c_pred = pred_s.shape[0]

    in_specs = [
        pl.BlockSpec((c_pred, T, LANES), lambda i: (0, i, 0)),
        pl.BlockSpec((5, T, LANES), lambda i: (0, i, 0)),
    ]
    args = [pred_s, targ_s]
    if weight_mode == 'stream':
        in_specs.append(pl.BlockSpec((T, LANES), lambda i: (i, 0)))
        args.extend(w_args)

    kernel = functools.partial(
        _gwd_kernel, alpha=float(alpha), tau=float(tau), fun=fun,
        normalize=True, n_boxes=n, weight_mode=weight_mode)

    itemsize = jnp.dtype(slab_dtype).itemsize
    bytes_accessed = ((pred_s.size + targ_s.size) * itemsize
                      + (w_args[0].size * 4 if weight_mode == 'stream' else 0)
                      + num_blocks * 8 * LANES * 4)
    cost = pl.CostEstimate(flops=40 * n_pad, transcendentals=7 * n_pad,
                           bytes_accessed=int(bytes_accessed))

    partial_sums = pl.pallas_call(
        kernel,
        out_shape=jax.ShapeDtypeStruct((num_blocks, 8, LANES), jnp.float32),
        grid_spec=pltpu.PrefetchScalarGridSpec(
            num_scalar_prefetch=0,
            grid=(num_blocks,),
            in_specs=in_specs,
            out_specs=pl.BlockSpec((1, 8, LANES), lambda i: (i, 0, 0)),
        ),
        compiler_params=pltpu.CompilerParams(
            dimension_semantics=("parallel",)),
        cost_estimate=cost,
    )(*args)

    total = jnp.sum(partial_sums)   # tiny final reduction in XLA

    if reduction == 'mean':
        denom = (jnp.float32(n) if avg_factor is None
                 else jnp.asarray(avg_factor, jnp.float32))
        total = total / denom
    return jnp.float32(loss_weight) * total


class GDLossPallas:
    """Pallas TPU implementation of mmdet's GDLoss forward pass (gwd variant)."""

    def __init__(self, loss_type='gwd', representation='xy_stddev_pearson',
                 fun='log1p', tau=0.0, alpha=1.0, reduction='mean',
                 loss_weight=1.0):
        assert loss_type == 'gwd'                       # TODO(synk): other bag losses
        assert representation == 'xy_stddev_pearson'    # TODO(synk): xy_wh_r
        assert reduction in ('mean', 'sum')             # TODO(synk): 'none'
        assert fun in ('log1p', 'none')
        self.fun = fun
        self.tau = float(tau)
        self.alpha = float(alpha)
        self.reduction = reduction
        self.loss_weight = float(loss_weight)

    def __call__(self, pred, target, weight=None, avg_factor=None,
                 reduction_override=None, **kwargs):
        assert reduction_override in (None, 'none', 'mean', 'sum')
        reduction = reduction_override if reduction_override else self.reduction
        assert reduction in ('mean', 'sum')
        # TODO(synk): torch short-circuits to (pred * weight).sum() when weight
        # has no positive entries.
        return _gwd_forward(pred, target, weight, avg_factor,
                            fun=self.fun, tau=self.tau, alpha=self.alpha,
                            reduction=reduction, loss_weight=self.loss_weight)


# ------------------------- pure-JAX reference -------------------------------
def _ref_gwd_per_box(pred, target, alpha=1.0, fun='log1p', tau=0.0):
    def prep(x):
        xy = x[..., :2]
        stddev = x[..., 2:4]
        pear = jnp.clip(x[..., 4], 1e-7 - 1.0, 1.0 - 1e-7)
        covar = pear * stddev[..., 0] * stddev[..., 1]
        var = stddev ** 2
        sigma = jnp.stack([var[..., 0], covar, covar, var[..., 1]],
                          axis=-1).reshape(x.shape[:-1] + (2, 2))
        return xy, sigma

    xy_p, Sp = prep(pred)
    xy_t, St = prep(target)
    xy_distance = jnp.sum((xy_p - xy_t) ** 2, axis=-1)
    whr = (jnp.trace(Sp, axis1=-2, axis2=-1) + jnp.trace(St, axis1=-2, axis2=-1))
    t_tr = jnp.trace(Sp @ St, axis1=-2, axis2=-1)
    t_det_sqrt = jnp.sqrt(jnp.maximum(jnp.linalg.det(Sp) * jnp.linalg.det(St), 0.0))
    whr = whr - 2.0 * jnp.sqrt(jnp.maximum(t_tr + 2.0 * t_det_sqrt, 0.0))
    dist = jnp.sqrt(jnp.maximum(xy_distance + alpha * alpha * whr, 0.0))
    scale = 2.0 * jnp.maximum(jnp.sqrt(jnp.sqrt(t_det_sqrt)), 1e-7)
    dist = dist / scale
    if fun == 'log1p':
        dist = jnp.log1p(dist)
    if tau >= 1.0:
        dist = 1.0 - 1.0 / (tau + dist)
    return dist


if __name__ == "__main__":
    key = jax.random.PRNGKey(0)
    ks = jax.random.split(key, 12)

    def make_boxes(kxy, ksd, kp, n):
        xy = jax.random.normal(kxy, (n, 2), jnp.float32) * 8.0
        sd = jax.random.uniform(ksd, (n, 2), jnp.float32, 1.0, 4.0)
        pr = jax.random.uniform(kp, (n, 1), jnp.float32, -0.6, 0.6)
        return jnp.concatenate([xy, sd, pr], axis=-1)  # (n, 5)

    loss_mod = GDLossPallas(loss_type='gwd', representation='xy_stddev_pearson',
                            fun='log1p', tau=0.0, alpha=1.0,
                            reduction='mean', loss_weight=1.0)

    # Case 1: small N, f32, no weight, mean reduction.
    N1 = 64
    pred1 = make_boxes(ks[0], ks[1], ks[2], N1)
    targ1 = make_boxes(ks[3], ks[4], ks[5], N1)
    out1 = jax.block_until_ready(loss_mod(pred1, targ1))
    ref1 = jax.block_until_ready(jnp.mean(_ref_gwd_per_box(pred1, targ1)))
    assert np.allclose(np.asarray(out1), np.asarray(ref1), rtol=1e-4, atol=1e-5), \
        (float(out1), float(ref1))

    # Case 2: larger N (padding of the last block), per-box weight packed as a
    # 6th component plane, explicit avg_factor.
    N2 = 2500
    pred2 = make_boxes(ks[6], ks[7], ks[8], N2)
    targ2 = make_boxes(ks[9], ks[10], ks[11], N2)
    w2 = jax.random.uniform(jax.random.PRNGKey(1), (N2,), jnp.float32, 0.0, 1.0)
    out2 = jax.block_until_ready(loss_mod(pred2, targ2, weight=w2,
                                          avg_factor=512.0))
    ref2 = jax.block_until_ready(
        jnp.sum(_ref_gwd_per_box(pred2, targ2) * w2) / 512.0)
    assert np.allclose(np.asarray(out2), np.asarray(ref2), rtol=1e-4, atol=1e-5), \
        (float(out2), float(ref2))

    # Case 3: bf16 inputs travel as bf16 slabs, compute stays f32 in-kernel.
    pred3 = pred1.astype(jnp.bfloat16)
    targ3 = targ1.astype(jnp.bfloat16)
    out3 = jax.block_until_ready(loss_mod(pred3, targ3))
    ref3 = jax.block_until_ready(
        jnp.mean(_ref_gwd_per_box(pred3.astype(jnp.float32),
                                  targ3.astype(jnp.float32))))
    assert np.allclose(np.asarray(out3), np.asarray(ref3), rtol=1e-4, atol=1e-5), \
        (float(out3), float(ref3))

    # Case 4: tau >= 1 with no weight exercises the explicit padding mask.
    N4 = 200
    pred4 = make_boxes(ks[0], ks[4], ks[8], N4)
    targ4 = make_boxes(ks[1], ks[5], ks[9], N4)
    loss_tau = GDLossPallas(tau=2.0)
    out4 = jax.block_until_ready(loss_tau(pred4, targ4))
    ref4 = jax.block_until_ready(
        jnp.mean(_ref_gwd_per_box(pred4, targ4, tau=2.0)))
    assert np.allclose(np.asarray(out4), np.asarray(ref4), rtol=1e-4, atol=1e-5), \
        (float(out4), float(ref4))

    print("KERNEL_OK")
</pallas_src>

<mosaic_0001>
module attributes {stable_mosaic.version = 11 : i64} {
  func.func @_gwd_kernel(%arg0: i32, %arg1: memref<5x8x128xf32, #tpu.memory_space<vmem>>, %arg2: memref<5x8x128xf32, #tpu.memory_space<vmem>>, %arg3: memref<1x8x128xf32, #tpu.memory_space<vmem>>) attributes {dimension_semantics = [#tpu.dimension_semantics<parallel>], iteration_bounds = array<i64: 1>, scalar_prefetch = 0 : i64, scratch_operands = 0 : i64, tpu.core_type = #tpu.core_type<tc>, window_params = [{transform_indices = @transform_0, window_bounds = array<i64: 5, 8, 128>}, {transform_indices = @transform_1, window_bounds = array<i64: 5, 8, 128>}, {transform_indices = @transform_2, window_bounds = array<i64: 1, 8, 128>}]} {
    %c0 = arith.constant 0 : index
    %c0_0 = arith.constant 0 : index
    %c0_1 = arith.constant 0 : index
    %0 = vector.load %arg1[%c0, %c0_0, %c0_1] : memref<5x8x128xf32, #tpu.memory_space<vmem>>, vector<1x8x128xf32>
    %1 = vector.shape_cast %0 : vector<1x8x128xf32> to vector<8x128xf32>
    %c1 = arith.constant 1 : index
    %c0_2 = arith.constant 0 : index
    %c0_3 = arith.constant 0 : index
    %2 = vector.load %arg1[%c1, %c0_2, %c0_3] : memref<5x8x128xf32, #tpu.memory_space<vmem>>, vector<1x8x128xf32>
    %3 = vector.shape_cast %2 : vector<1x8x128xf32> to vector<8x128xf32>
    %c2 = arith.constant 2 : index
    %c0_4 = arith.constant 0 : index
    %c0_5 = arith.constant 0 : index
    %4 = vector.load %arg1[%c2, %c0_4, %c0_5] : memref<5x8x128xf32, #tpu.memory_space<vmem>>, vector<1x8x128xf32>
    %5 = vector.shape_cast %4 : vector<1x8x128xf32> to vector<8x128xf32>
    %c3 = arith.constant 3 : index
    %c0_6 = arith.constant 0 : index
    %c0_7 = arith.constant 0 : index
    %6 = vector.load %arg1[%c3, %c0_6, %c0_7] : memref<5x8x128xf32, #tpu.memory_space<vmem>>, vector<1x8x128xf32>
    %7 = vector.shape_cast %6 : vector<1x8x128xf32> to vector<8x128xf32>
    %c4 = arith.constant 4 : index
    %c0_8 = arith.constant 0 : index
    %c0_9 = arith.constant 0 : index
    %8 = vector.load %arg1[%c4, %c0_8, %c0_9] : memref<5x8x128xf32, #tpu.memory_space<vmem>>, vector<1x8x128xf32>
    %9 = vector.shape_cast %8 : vector<1x8x128xf32> to vector<8x128xf32>
    %cst = arith.constant -0.99999988 : f32
    %cst_10 = arith.constant 0.99999988 : f32
    %10 = vector.broadcast %cst : f32 to vector<8x128xf32>
    %11 = arith.maximumf %10, %9 : vector<8x128xf32>
    %12 = vector.broadcast %cst_10 : f32 to vector<8x128xf32>
    %13 = arith.minimumf %12, %11 : vector<8x128xf32>
    %c0_11 = arith.constant 0 : index
    %c0_12 = arith.constant 0 : index
    %c0_13 = arith.constant 0 : index
    %14 = vector.load %arg2[%c0_11, %c0_12, %c0_13] : memref<5x8x128xf32, #tpu.memory_space<vmem>>, vector<1x8x128xf32>
    %15 = vector.shape_cast %14 : vector<1x8x128xf32> to vector<8x128xf32>
    %c1_14 = arith.constant 1 : index
    %c0_15 = arith.constant 0 : index
    %c0_16 = arith.constant 0 : index
    %16 = vector.load %arg2[%c1_14, %c0_15, %c0_16] : memref<5x8x128xf32, #tpu.memory_space<vmem>>, vector<1x8x128xf32>
    %17 = vector.shape_cast %16 : vector<1x8x128xf32> to vector<8x128xf32>
    %c2_17 = arith.constant 2 : index
    %c0_18 = arith.constant 0 : index
    %c0_19 = arith.constant 0 : index
    %18 = vector.load %arg2[%c2_17, %c0_18, %c0_19] : memref<5x8x128xf32, #tpu.memory_space<vmem>>, vector<1x8x128xf32>
    %19 = vector.shape_cast %18 : vector<1x8x128xf32> to vector<8x128xf32>
    %c3_20 = arith.constant 3 : index
    %c0_21 = arith.constant 0 : index
    %c0_22 = arith.constant 0 : index
    %20 = vector.load %arg2[%c3_20, %c0_21, %c0_22] : memref<5x8x128xf32, #tpu.memory_space<vmem>>, vector<1x8x128xf32>
    %21 = vector.shape_cast %20 : vector<1x8x128xf32> to vector<8x128xf32>
    %c4_23 = arith.constant 4 : index
    %c0_24 = arith.constant 0 : index
    %c0_25 = arith.constant 0 : index
    %22 = vector.load %arg2[%c4_23, %c0_24, %c0_25] : memref<5x8x128xf32, #tpu.memory_space<vmem>>, vector<1x8x128xf32>
    %23 = vector.shape_cast %22 : vector<1x8x128xf32> to vector<8x128xf32>
    %cst_26 = arith.constant -0.99999988 : f32
    %cst_27 = arith.constant 0.99999988 : f32
    %24 = vector.broadcast %cst_26 : f32 to vector<8x128xf32>
    %25 = arith.maximumf %24, %23 : vector<8x128xf32>
    %26 = vector.broadcast %cst_27 : f32 to vector<8x128xf32>
    %27 = arith.minimumf %26, %25 : vector<8x128xf32>
    %28 = arith.mulf %5, %5 : vector<8x128xf32>
    %29 = arith.mulf %7, %7 : vector<8x128xf32>
    %30 = arith.mulf %13, %5 : vector<8x128xf32>
    %31 = arith.mulf %30, %7 : vector<8x128xf32>
    %32 = arith.mulf %19, %19 : vector<8x128xf32>
    %33 = arith.mulf %21, %21 : vector<8x128xf32>
    %34 = arith.mulf %27, %19 : vector<8x128xf32>
    %35 = arith.mulf %34, %21 : vector<8x128xf32>
    %36 = arith.subf %1, %15 : vector<8x128xf32>
    %37 = arith.subf %3, %17 : vector<8x128xf32>
    %38 = arith.mulf %36, %36 : vector<8x128xf32>
    %39 = arith.mulf %37, %37 : vector<8x128xf32>
    %40 = arith.addf %38, %39 : vector<8x128xf32>
    %41 = arith.addf %28, %29 : vector<8x128xf32>
    %42 = arith.addf %41, %32 : vector<8x128xf32>
    %43 = arith.addf %42, %33 : vector<8x128xf32>
    %44 = arith.mulf %28, %32 : vector<8x128xf32>
    %cst_28 = arith.constant 2.000000e+00 : f32
    %45 = vector.broadcast %cst_28 : f32 to vector<8x128xf32>
    %46 = arith.mulf %45, %31 : vector<8x128xf32>
    %47 = arith.mulf %46, %35 : vector<8x128xf32>
    %48 = arith.addf %44, %47 : vector<8x128xf32>
    %49 = arith.mulf %29, %33 : vector<8x128xf32>
    %50 = arith.addf %48, %49 : vector<8x128xf32>
    %51 = arith.mulf %28, %29 : vector<8x128xf32>
    %52 = arith.mulf %31, %31 : vector<8x128xf32>
    %53 = arith.subf %51, %52 : vector<8x128xf32>
    %54 = arith.mulf %32, %33 : vector<8x128xf32>
    %55 = arith.mulf %35, %35 : vector<8x128xf32>
    %56 = arith.subf %54, %55 : vector<8x128xf32>
    %57 = arith.mulf %53, %56 : vector<8x128xf32>
    %cst_29 = arith.constant 0.000000e+00 : f32
    %58 = vector.broadcast %cst_29 : f32 to vector<8x128xf32>
    %59 = arith.maximumf %57, %58 : vector<8x128xf32>
    %60 = math.sqrt %59 : vector<8x128xf32>
    %cst_30 = arith.constant 2.000000e+00 : f32
    %61 = vector.broadcast %cst_30 : f32 to vector<8x128xf32>
    %62 = arith.mulf %61, %60 : vector<8x128xf32>
    %63 = arith.addf %50, %62 : vector<8x128xf32>
    %cst_31 = arith.constant 0.000000e+00 : f32
    %64 = vector.broadcast %cst_31 : f32 to vector<8x128xf32>
    %65 = arith.maximumf %63, %64 : vector<8x128xf32>
    %66 = math.sqrt %65 : vector<8x128xf32>
    %cst_32 = arith.constant 2.000000e+00 : f32
    %67 = vector.broadcast %cst_32 : f32 to vector<8x128xf32>
    %68 = arith.mulf %67, %66 : vector<8x128xf32>
    %69 = arith.subf %43, %68 : vector<8x128xf32>
    %cst_33 = arith.constant 1.000000e+00 : f32
    %70 = vector.broadcast %cst_33 : f32 to vector<8x128xf32>
    %71 = arith.mulf %70, %69 : vector<8x128xf32>
    %72 = arith.addf %40, %71 : vector<8x128xf32>
    %cst_34 = arith.constant 0.000000e+00 : f32
    %73 = vector.broadcast %cst_34 : f32 to vector<8x128xf32>
    %74 = arith.maximumf %72, %73 : vector<8x128xf32>
    %75 = math.sqrt %74 : vector<8x128xf32>
    %76 = math.sqrt %60 : vector<8x128xf32>
    %77 = math.sqrt %76 : vector<8x128xf32>
    %cst_35 = arith.constant 1.000000e-07 : f32
    %78 = vector.broadcast %cst_35 : f32 to vector<8x128xf32>
    %79 = arith.maximumf %77, %78 : vector<8x128xf32>
    %cst_36 = arith.constant 2.000000e+00 : f32
    %80 = vector.broadcast %cst_36 : f32 to vector<8x128xf32>
    %81 = arith.mulf %80, %79 : vector<8x128xf32>
    %82 = tpu.reciprocal %81 : vector<8x128xf32> -> vector<8x128xf32>
    %83 = arith.mulf %75, %82 : vector<8x128xf32>
    %84 = math.log1p %83 : vector<8x128xf32>
    %c0_37 = arith.constant 0 : index
    %c0_38 = arith.constant 0 : index
    %c0_39 = arith.constant 0 : index
    %85 = vector.load %arg3[%c0_37, %c0_38, %c0_39] : memref<1x8x128xf32, #tpu.memory_space<vmem>>, vector<1x8x128xf32>
    %86 = vector.shape_cast %85 : vector<1x8x128xf32> to vector<8x128xf32>
    %87 = vector.shape_cast %84 : vector<8x128xf32> to vector<1x8x128xf32>
    tpu.vector_store %arg3[%c0_37, %c0_38, %c0_39], %87 {strides = array<i32>} : memref<1x8x128xf32, #tpu.memory_space<vmem>>, vector<1x8x128xf32>,
    return
  }
  func.func @transform_0(%arg0: i32) -> (i32, i32, i32) {
    %c0_i32 = arith.constant 0 : i32
    %c0_i32_0 = arith.constant 0 : i32
    %c0_i32_1 = arith.constant 0 : i32
    return %c0_i32, %arg0, %c0_i32_0 : i32, i32, i32
  }
  func.func @transform_1(%arg0: i32) -> (i32, i32, i32) {
    %c0_i32 = arith.constant 0 : i32
    %c0_i32_0 = arith.constant 0 : i32
    %c0_i32_1 = arith.constant 0 : i32
    return %c0_i32, %arg0, %c0_i32_0 : i32, i32, i32
  }
  func.func @transform_2(%arg0: i32) -> (i32, i32, i32) {
    %c0_i32 = arith.constant 0 : i32
    %c0_i32_0 = arith.constant 0 : i32
    %c0_i32_1 = arith.constant 0 : i32
    return %arg0, %c0_i32, %c0_i32_0 : i32, i32, i32
  }
}

</mosaic_0001>

<bundles_post_ra>
// kernel: _gwd_forward.1
= control target key start
LH: loop header
LB: loop body
LE: loop exit
PB: predicated region body
PF: predicated region fallthrough
CT: control target
= control target key end

     0   :  { %s195_s0 = inlined_call_operand.vmem [shape: f32[5,8,128], index: 0, kind: input, shape index: {}]   ;;  %s196_s1 = inlined_call_operand.vmem [shape: f32[5,8,128], index: 1, kind: input, shape index: {}]   ;;  %s197_s2 = inlined_call_operand.vmem [shape: f32[1,8,128], index: 2, kind: output, shape index: {}]  }
   0x1   :  { %v124_v0 = vld [vmem:[%s195_s0 + $0x10] sm:$0xff]  ;;  %v125_v1 = vld [vmem:[%s195_s0 + $0x18] sm:$0xff]  ;;  %v126_v2 = vld [vmem:[%s195_s0 + $0x20] sm:$0xff] }
   0x2   :  { %v127_v3 = vclamps-f32 %v126_v2, 0.9999999  ;;  %v130_v4 = vld [vmem:[%s196_s1 + $0x18] sm:$0xff]  ;;  %v33_v5 = vmul.f32 %v124_v0, %v124_v0  ;;  %v34_v6 = vmul.f32 %v125_v1, %v125_v1  ;;  %v129_v7 = vld [vmem:[%s196_s1 + $0x10] sm:$0xff]  ;;  %v131_v8 = vld [vmem:[%s196_s1 + $0x20] sm:$0xff] }
   0x3   :  { %v132_v9 = vclamps-f32 %v131_v8, 0.9999999  ;;  %v37_v11 = vmul.f32 %v129_v7, %v129_v7  ;;  %v38_v12 = vmul.f32 %v130_v4, %v130_v4  ;;  %v11_v38 = vld [vmem:[%s195_s0] sm:$0xff]  ;;  %v123_v40 = vld [vmem:[%s195_s0 + $0x8] sm:$0xff] }
   0x4   :  { %v35_v10 = vmul.f32 %v127_v3, %v124_v0  ;;  %v55_v15 = vmul.f32 %v34_v6, %v33_v5  ;;  %v22_v41 = vld [vmem:[%s196_s1] sm:$0xff]  ;;  %v128_v42 = vld [vmem:[%s196_s1 + $0x8] sm:$0xff]  ;;  %v46_v44 = vadd.f32 %v34_v6, %v33_v5 }
   0x5   :  { %v39_v14 = vmul.f32 %v132_v9, %v129_v7  ;;  %v58_v18 = vmul.f32 %v38_v12, %v37_v11  ;;  %v49_v25 = vmul.f32 %v37_v11, %v33_v5  ;;  %v53_v28 = vmul.f32 %v38_v12, %v34_v6 }
   0x6   :  { %v36_v13 = vmul.f32 %v125_v1, %v35_v10  ;;  %v41_v46 = vsub.f32 %v11_v38, %v22_v41  ;;  %v42_v47 = vsub.f32 %v123_v40, %v128_v42  ;;  %v47_v50 = vadd.f32 %v46_v44, %v37_v11 }
   0x7   :  { %v40_v16 = vmul.f32 %v130_v4, %v39_v14 }
   0x8   :  { %v56_v17 = vmul.f32 %v36_v13, %v36_v13  ;;  %v50_v24 = vmul.f32 2.0, %v36_v13  ;;  %v43_v53 = vmul.f32 %v41_v46, %v41_v46  ;;  %v44_v54 = vmul.f32 %v42_v47, %v42_v47 }
   0x9   :  { %v59_v20 = vmul.f32 %v40_v16, %v40_v16  ;;  %v48_v56 = vadd.f32 %v47_v50, %v38_v12 }
   0xa   :  { %v57_v19 = vsub.f32 %v55_v15, %v56_v17  ;;  %v51_v26 = vmul.f32 %v50_v24, %v40_v16  ;;  %v45_v59 = vadd.f32 %v44_v54, %v43_v53 }
   0xb   :  { %v60_v21 = vsub.f32 %v58_v18, %v59_v20 }
   0xc   :  { %v52_v27 = vadd.f32 %v51_v26, %v49_v25 }
   0xd   :  { %v61_v22 = vmul.f32 %v60_v21, %v57_v19 }
   0xe   :  { %v54_v32 = vadd.f32 %v53_v28, %v52_v27 }
   0xf   :  { %v62_v23 = vmax.f32 %v61_v22, 0.0 }
  0x11   :  { %133 = vrsqrt.f32 %v62_v23  ;;  %vm65_vm0 = vcmp.eq.f32.partialorder %v62_v23, inf  ;;  %v68_v30 = vand.u32 2147483648, %v62_v23  ;;  %vm67_vm1 = vcmp.eq.f32.partialorder %v62_v23, 0.0 }
  0x1b   :  { %v134_v29 = vpop.eup %133 }
  0x1c   :  { %v64_v31 = vmul.f32 %v134_v29, %v62_v23 }
  0x1e   :  { %v66_v33 = vsel %vm65_vm0, %v62_v23, %v64_v31 }
  0x1f   :  { %v69_v34 = vsel %vm67_vm1, %v68_v30, %v66_v33 }
  0x20   :  { %v70_v35 = vmul.f32 2.0, %v69_v34  ;;  %135 = vrsqrt.f32 %v69_v34  ;;  %vm93_vm2 = vcmp.eq.f32.partialorder %v69_v34, inf  ;;  %v96_v43 = vand.u32 2147483648, %v69_v34 }
  0x21   :  { %vm95_vm3 = vcmp.eq.f32.partialorder %v69_v34, 0.0 }
  0x22   :  { %v71_v36 = vadd.f32 %v70_v35, %v54_v32 }
  0x24   :  { %v72_v37 = vmax.f32 %v71_v36, 0.0 }
  0x26   :  { %137 = vrsqrt.f32 %v72_v37  ;;  %vm75_vm4 = vcmp.eq.f32.partialorder %v72_v37, inf  ;;  %v78_v52 = vand.u32 2147483648, %v72_v37  ;;  %vm77_vm5 = vcmp.eq.f32.partialorder %v72_v37, 0.0 }
  0x2a   :  { %v136_v39 = vpop.eup %135 }
  0x2b   :  { %v92_v45 = vmul.f32 %v136_v39, %v69_v34 }
  0x2d   :  { %v94_v48 = vsel %vm93_vm2, %v69_v34, %v92_v45 }
  0x2e   :  { %v97_v49 = vsel %vm95_vm3, %v96_v43, %v94_v48 }
  0x2f   :  { %139 = vrsqrt.f32 %v97_v49  ;;  %vm100_vm6 = vcmp.eq.f32.partialorder %v97_v49, inf  ;;  %v103_v1 = vand.u32 2147483648, %v97_v49  ;;  %vm102_vm7 = vcmp.eq.f32.partialorder %v97_v49, 0.0 }
  0x30   :  { %v138_v51 = vpop.eup %137 }
  0x31   :  { %v74_v55 = vmul.f32 %v138_v51, %v72_v37 }
  0x33   :  { %v76_v57 = vsel %vm75_vm4, %v72_v37, %v74_v55 }
  0x34   :  { %v79_v58 = vsel %vm77_vm5, %v78_v52, %v76_v57 }
  0x35   :  { %v80_v60 = vmul.f32 2.0, %v79_v58 }
  0x37   :  { %v81_v61 = vsub.f32 %v48_v56, %v80_v60 }
  0x39   :  { %v140_v62 = vpop.eup %139  ;;  %v82_v63 = vadd.f32 %v81_v61, %v45_v59 }
  0x3a   :  { %v99_v0 = vmul.f32 %v140_v62, %v97_v49 }
  0x3b   :  { %v83_v2 = vmax.f32 %v82_v63, 0.0 }
  0x3c   :  { %v101_v3 = vsel %vm100_vm6, %v97_v49, %v99_v0 }
  0x3d   :  { %141 = vrsqrt.f32 %v83_v2  ;;  %v104_v4 = vsel %vm102_vm7, %v103_v1, %v101_v3  ;;  %vm86_vm8 = vcmp.eq.f32.partialorder %v83_v2, inf  ;;  %v89_v8 = vand.u32 2147483648, %v83_v2 }
  0x3e   :  { %v105_v5 = vmax.f32 %v104_v4, 1e-07  ;;  %vm88_vm9 = vcmp.eq.f32.partialorder %v83_v2, 0.0 }
  0x40   :  { %v106_v6 = vmul.f32 2.0, %v105_v5 }
  0x42   :  { %143 = vrcp.f32 %v106_v6 }
  0x47   :  { %v142_v7 = vpop.eup %141 }
  0x48   :  { %v85_v9 = vmul.f32 %v142_v7, %v83_v2 }
  0x4a   :  { %v87_v10 = vsel %vm86_vm8, %v83_v2, %v85_v9 }
  0x4b   :  { %v90_v11 = vsel %vm88_vm9, %v89_v8, %v87_v10 }
  0x4c   :  { %v144_v12 = vpop.eup %143 }
  0x4d   :  { %v108_v13 = vmul.f32 %v144_v12, %v90_v11 }
  0x4f   :  { %v109_v14 = vadd.f32 1.0, %v108_v13  ;;  %v112_v15 = vmul.f32 -0.5, %v108_v13  ;;  %v115_v17 = vand.u32 2147483647, %v108_v13 }
  0x51   :  { %145 = vlog2.f32 %v109_v14  ;;  %v113_v16 = vadd.f32 1.0, %v112_v15  ;;  %vm116_vm10 = vcmp.lt.f32.partialorder %v115_v17, 0.0004427343 }
  0x53   :  { %v114_v18 = vmul.f32 %v113_v16, %v108_v13 }
  0x5b   :  { %v146_v19 = vpop.eup %145 }
  0x5c   :  { %v111_v20 = vmul.f32 0.6931472, %v146_v19 }
  0x5e   :  { %v117_v21 = vsel %vm116_vm10, %v114_v18, %v111_v20 }
  0x5f   :  { %118 = vst [vmem:[%s197_s2] sm:$0xff] %v117_v21 }

</bundles_post_ra>
